<compile_context>
chip_gen: v7x
topology: tpu7x:2x2x1
jax: 0.10.0
libtpu: 0.0.40
codegen_flags: <defaults>
</compile_context>

<pallas_src>
import functools

import jax
import jax.numpy as jnp
from jax.experimental import pallas as pl
from jax.experimental.pallas import tpu as pltpu


def _masked_loss_kernel(x_ref, y_ref, m_ref, sq_out_ref, m_out_ref,
                        sq_acc, m_acc, *, hw_total, hw_tile, n_inner,
                        needs_tail_mask):
    o = pl.program_id(1)          # HW segment (outer, parallel)
    i = pl.program_id(2)          # HW chunk within segment (reduction)
    n_i = pl.num_programs(2)

    # Reset per-(sample, segment) accumulators at the first chunk.
    @pl.when(i == 0)
    def _():
        sq_acc[...] = jnp.zeros_like(sq_acc)
        m_acc[...] = jnp.zeros_like(m_acc)

    x = x_ref[0].astype(jnp.float32)      # (C, hw_tile)
    y = y_ref[0].astype(jnp.float32)      # (C, hw_tile)
    m = m_ref[0].astype(jnp.float32)      # (1, hw_tile), broadcasts over C

    if needs_tail_mask:
        # The last HW chunk overhangs the true HW extent; its overhang lanes
        # hold unspecified data.  Select (not multiply) so even NaN garbage is
        # discarded.  `chunk` is the logical chunk index, so a clamped / stale
        # tail block can never double-count real data either.
        chunk = o * n_inner + i
        lane = jax.lax.broadcasted_iota(jnp.int32, (1, hw_tile), 1)
        valid = (chunk * hw_tile + lane) < hw_total
        m = jnp.where(valid, m, 0.0)
        d = jnp.where(valid, (y - x) * m, 0.0)
    else:
        d = (y - x) * m                   # == output*mask - input*mask

    sq_acc[...] += d * d                  # pure VPU elementwise accumulation
    m_acc[...] += m

    # Finalize once per (sample, segment): one cross-lane reduce + store.
    @pl.when(i == n_i - 1)
    def _():
        sq_out_ref[...] = jnp.zeros(sq_out_ref.shape, jnp.float32) + jnp.sum(sq_acc[...])
        m_out_ref[...] = jnp.zeros(m_out_ref.shape, jnp.float32) + jnp.sum(m_acc[...])


def masked_loss(input_batch, output_batch, mask):
    """input_batch, output_batch: (B, C, H, W); mask: (B, 1, H, W) (0/1 floats).

    Returns the scalar MaskedLoss (matches the PyTorch reference)."""
    B, C, H, W = input_batch.shape
    HW = H * W

    x = input_batch.reshape(B, C, HW)
    y = output_batch.reshape(B, C, HW)
    m = mask.reshape(B, 1, HW)

    LANE = 128

    # --- Per-generation tile / VMEM budgeting -------------------------------
    try:
        vmem_cap = int(pltpu.get_tpu_info().vmem_capacity_bytes)
    except Exception:
        vmem_cap = 64 * 1024 * 1024          # conservative (v7x-sized) fallback
    if vmem_cap >= 96 * 1024 * 1024:          # v5e / v6e: 128 MiB VMEM
        tile_budget_bytes = 8 * 1024 * 1024   # per-input block target
        vmem_limit_bytes = 80 * 1024 * 1024
    else:                                     # v7x: 64 MiB VMEM
        tile_budget_bytes = 4 * 1024 * 1024
        vmem_limit_bytes = 44 * 1024 * 1024

    # Size hw_tile by bytes (assume worst-case f32 buffers so the f32 scratch
    # accumulator is also covered); no hard lane cap.
    max_lanes = (tile_budget_bytes // (C * 4)) // LANE * LANE
    max_lanes = max(LANE, max_lanes)

    hw_ceil = -(-HW // LANE) * LANE           # lanes needed to cover HW
    hw_tile = min(hw_ceil, max_lanes)         # always a multiple of 128
    n_hw = -(-HW // hw_tile)                  # chunks (last may be ragged)
    needs_tail_mask = (n_hw * hw_tile) != HW  # ragged tail handled in-kernel

    # --- Grid layout ---------------------------------------------------------
    # (B, n_outer, n_inner): batch and HW-segment axes are "parallel" (megacore
    # on v7x), the within-segment chunk axis is the reduction and comes last.
    # When B == 1 (large-image inference) split the HW chunks across 2 parallel
    # segments so v7x's second TensorCore isn't idle; no-op on v5e/v6e.
    if B == 1 and n_hw >= 2 and n_hw % 2 == 0:
        n_outer = 2
    else:
        n_outer = 1
    n_inner = n_hw // n_outer

    kernel = functools.partial(
        _masked_loss_kernel,
        hw_total=HW, hw_tile=hw_tile, n_inner=n_inner,
        needs_tail_mask=needs_tail_mask)

    partial_sq, partial_m = pl.pallas_call(
        kernel,
        out_shape=(
            jax.ShapeDtypeStruct((B, n_outer, 8, 128), jnp.float32),
            jax.ShapeDtypeStruct((B, n_outer, 8, 128), jnp.float32),
        ),
        grid=(B, n_outer, n_inner),
        in_specs=[
            pl.BlockSpec((1, C, hw_tile), lambda b, o, i: (b, 0, o * n_inner + i)),
            pl.BlockSpec((1, C, hw_tile), lambda b, o, i: (b, 0, o * n_inner + i)),
            pl.BlockSpec((1, 1, hw_tile), lambda b, o, i: (b, 0, o * n_inner + i)),
        ],
        # Lane-dense per-(sample, segment) output tiles; resident across the
        # inner reduction axis.
        out_specs=[
            pl.BlockSpec((1, 1, 8, 128), lambda b, o, i: (b, o, 0, 0)),
            pl.BlockSpec((1, 1, 8, 128), lambda b, o, i: (b, o, 0, 0)),
        ],
        scratch_shapes=[
            pltpu.VMEM((C, hw_tile), jnp.float32),   # squared-error accumulator
            pltpu.VMEM((1, hw_tile), jnp.float32),   # mask-sum accumulator
        ],
        compiler_params=pltpu.CompilerParams(
            dimension_semantics=("parallel", "parallel", "arbitrary"),
            vmem_limit_bytes=vmem_limit_bytes,
        ),
    )(x, y, m)

    # Combine partial sums, divide, and average over the batch in the wrapper
    # (cheap scalar work on B * n_outer values).
    sq_per_sample = jnp.sum(partial_sq[:, :, 0, 0], axis=1)      # (B,)
    mask_per_sample = jnp.sum(partial_m[:, :, 0, 0], axis=1)     # (B,)
    per_sample_loss = sq_per_sample / (mask_per_sample * C)
    return jnp.sum(per_sample_loss) / B


def _reference(input_batch, output_batch, mask):
    # Pure-JAX reference matching the PyTorch loop exactly.
    B, C, _, _ = input_batch.shape
    x = input_batch * mask
    y = output_batch * mask
    total = 0.0
    for b in range(B):
        r = jnp.sum(mask[b]) * C
        total = total + jnp.sum((y[b] - x[b]) ** 2) / r
    return total / B


if __name__ == "__main__":
    key = jax.random.PRNGKey(0)
    k1, k2, k3 = jax.random.split(key, 3)

    B, C, H, W = 2, 4, 16, 16
    input_batch = jax.random.normal(k1, (B, C, H, W), dtype=jnp.float32)
    output_batch = jax.random.normal(k2, (B, C, H, W), dtype=jnp.float32)
    mask = jax.random.bernoulli(k3, p=0.5, shape=(B, 1, H, W)).astype(jnp.float32)

    loss = jax.block_until_ready(masked_loss(input_batch, output_batch, mask))

    ref = _reference(input_batch, output_batch, mask)
    assert jnp.allclose(loss, ref, rtol=1e-5, atol=1e-6), (loss, ref)

    print("KERNEL_OK")
</pallas_src>

<mosaic_0001>
module attributes {stable_mosaic.version = 11 : i64} {
  func.func @_masked_loss_kernel(%arg0: i32, %arg1: i32, %arg2: i32, %arg3: memref<1x4x256xf32, #tpu.memory_space<vmem>>, %arg4: memref<1x4x256xf32, #tpu.memory_space<vmem>>, %arg5: memref<1x1x256xf32, #tpu.memory_space<vmem>>, %arg6: memref<1x1x8x128xf32, #tpu.memory_space<vmem>>, %arg7: memref<1x1x8x128xf32, #tpu.memory_space<vmem>>, %arg8: memref<4x256xf32, #tpu.memory_space<vmem>>, %arg9: memref<1x256xf32, #tpu.memory_space<vmem>>) attributes {dimension_semantics = [#tpu.dimension_semantics<parallel>, #tpu.dimension_semantics<parallel>, #tpu.dimension_semantics<arbitrary>], iteration_bounds = array<i64: 2, 1, 1>, scalar_prefetch = 0 : i64, scratch_operands = 2 : i64, tpu.core_type = #tpu.core_type<tc>, window_params = [{transform_indices = @transform_0, window_bounds = array<i64: 1, 4, 256>}, {transform_indices = @transform_1, window_bounds = array<i64: 1, 4, 256>}, {transform_indices = @transform_2, window_bounds = array<i64: 1, 1, 256>}, {transform_indices = @transform_3, window_bounds = array<i64: 1, 1, 8, 128>}, {transform_indices = @transform_4, window_bounds = array<i64: 1, 1, 8, 128>}]} {
    %c0_i32 = arith.constant 0 : i32
    %0 = arith.cmpi eq, %arg2, %c0_i32 : i32
    %1 = arith.extui %0 : i1 to i32
    %c0_i32_0 = arith.constant 0 : i32
    %2 = arith.cmpi ne, %1, %c0_i32_0 : i32
    scf.if %2 {
      %cst = arith.constant 0.000000e+00 : f32
      %22 = vector.broadcast %cst : f32 to vector<4x256xf32>
      %c0_19 = arith.constant 0 : index
      %c0_20 = arith.constant 0 : index
      %23 = vector.load %arg8[%c0_19, %c0_20] : memref<4x256xf32, #tpu.memory_space<vmem>>, vector<4x256xf32>
      tpu.vector_store %arg8[%c0_19, %c0_20], %22 {strides = array<i32>} : memref<4x256xf32, #tpu.memory_space<vmem>>, vector<4x256xf32>,
      %cst_21 = arith.constant 0.000000e+00 : f32
      %24 = vector.broadcast %cst_21 : f32 to vector<1x256xf32>
      %c0_22 = arith.constant 0 : index
      %c0_23 = arith.constant 0 : index
      %25 = vector.load %arg9[%c0_22, %c0_23] : memref<1x256xf32, #tpu.memory_space<vmem>>, vector<1x256xf32>
      tpu.vector_store %arg9[%c0_22, %c0_23], %24 {strides = array<i32>} : memref<1x256xf32, #tpu.memory_space<vmem>>, vector<1x256xf32>,
    } else {
    }
    %c0 = arith.constant 0 : index
    %c0_1 = arith.constant 0 : index
    %c0_2 = arith.constant 0 : index
    %3 = vector.load %arg3[%c0, %c0_1, %c0_2] : memref<1x4x256xf32, #tpu.memory_space<vmem>>, vector<1x4x256xf32>
    %4 = vector.shape_cast %3 : vector<1x4x256xf32> to vector<4x256xf32>
    %c0_3 = arith.constant 0 : index
    %c0_4 = arith.constant 0 : index
    %c0_5 = arith.constant 0 : index
    %5 = vector.load %arg4[%c0_3, %c0_4, %c0_5] : memref<1x4x256xf32, #tpu.memory_space<vmem>>, vector<1x4x256xf32>
    %6 = vector.shape_cast %5 : vector<1x4x256xf32> to vector<4x256xf32>
    %c0_6 = arith.constant 0 : index
    %c0_7 = arith.constant 0 : index
    %c0_8 = arith.constant 0 : index
    %7 = vector.load %arg5[%c0_6, %c0_7, %c0_8] : memref<1x1x256xf32, #tpu.memory_space<vmem>>, vector<1x1x256xf32>
    %8 = vector.shape_cast %7 : vector<1x1x256xf32> to vector<1x256xf32>
    %9 = arith.subf %6, %4 : vector<4x256xf32>
    %10 = vector.broadcast %8 : vector<1x256xf32> to vector<4x256xf32>
    %11 = arith.mulf %9, %10 : vector<4x256xf32>
    %c0_9 = arith.constant 0 : index
    %c0_10 = arith.constant 0 : index
    %12 = vector.load %arg8[%c0_9, %c0_10] : memref<4x256xf32, #tpu.memory_space<vmem>>, vector<4x256xf32>
    %13 = arith.mulf %11, %11 : vector<4x256xf32>
    %14 = arith.addf %12, %13 : vector<4x256xf32>
    %c0_11 = arith.constant 0 : index
    %c0_12 = arith.constant 0 : index
    %15 = vector.load %arg8[%c0_11, %c0_12] : memref<4x256xf32, #tpu.memory_space<vmem>>, vector<4x256xf32>
    tpu.vector_store %arg8[%c0_11, %c0_12], %14 {strides = array<i32>} : memref<4x256xf32, #tpu.memory_space<vmem>>, vector<4x256xf32>,
    %c0_13 = arith.constant 0 : index
    %c0_14 = arith.constant 0 : index
    %16 = vector.load %arg9[%c0_13, %c0_14] : memref<1x256xf32, #tpu.memory_space<vmem>>, vector<1x256xf32>
    %17 = arith.addf %16, %8 : vector<1x256xf32>
    %c0_15 = arith.constant 0 : index
    %c0_16 = arith.constant 0 : index
    %18 = vector.load %arg9[%c0_15, %c0_16] : memref<1x256xf32, #tpu.memory_space<vmem>>, vector<1x256xf32>
    tpu.vector_store %arg9[%c0_15, %c0_16], %17 {strides = array<i32>} : memref<1x256xf32, #tpu.memory_space<vmem>>, vector<1x256xf32>,
    %c0_i32_17 = arith.constant 0 : i32
    %19 = arith.cmpi eq, %arg2, %c0_i32_17 : i32
    %20 = arith.extui %19 : i1 to i32
    %c0_i32_18 = arith.constant 0 : i32
    %21 = arith.cmpi ne, %20, %c0_i32_18 : i32
    scf.if %21 {
      %cst = arith.constant 0.000000e+00 : f32
      %22 = vector.broadcast %cst : f32 to vector<1x1x8x128xf32>
      %c0_19 = arith.constant 0 : index
      %c0_20 = arith.constant 0 : index
      %23 = vector.load %arg8[%c0_19, %c0_20] : memref<4x256xf32, #tpu.memory_space<vmem>>, vector<4x256xf32>
      %24 = vector.shape_cast %23 : vector<4x256xf32> to vector<1x4x256xf32>
      %cst_21 = arith.constant dense<0.000000e+00> : vector<1xf32>
      %25 = vector.multi_reduction <add>, %24, %cst_21 [1, 2] : vector<1x4x256xf32> to vector<1xf32>
      %26 = vector.shape_cast %25 : vector<1xf32> to vector<1x1x1xf32>
      %27 = vector.extract %26[0, 0, 0] : f32 from vector<1x1x1xf32>
      %28 = vector.broadcast %27 : f32 to vector<1x1x8x128xf32>
      %29 = arith.addf %22, %28 : vector<1x1x8x128xf32>
      %c0_22 = arith.constant 0 : index
      %c0_23 = arith.constant 0 : index
      %c0_24 = arith.constant 0 : index
      %c0_25 = arith.constant 0 : index
      %30 = vector.load %arg6[%c0_22, %c0_23, %c0_24, %c0_25] : memref<1x1x8x128xf32, #tpu.memory_space<vmem>>, vector<1x1x8x128xf32>
      tpu.vector_store %arg6[%c0_22, %c0_23, %c0_24, %c0_25], %29 {strides = array<i32>} : memref<1x1x8x128xf32, #tpu.memory_space<vmem>>, vector<1x1x8x128xf32>,
      %cst_26 = arith.constant 0.000000e+00 : f32
      %31 = vector.broadcast %cst_26 : f32 to vector<1x1x8x128xf32>
      %c0_27 = arith.constant 0 : index
      %c0_28 = arith.constant 0 : index
      %32 = vector.load %arg9[%c0_27, %c0_28] : memref<1x256xf32, #tpu.memory_space<vmem>>, vector<1x256xf32>
      %33 = vector.shape_cast %32 : vector<1x256xf32> to vector<1x1x256xf32>
      %cst_29 = arith.constant dense<0.000000e+00> : vector<1xf32>
      %34 = vector.multi_reduction <add>, %33, %cst_29 [1, 2] : vector<1x1x256xf32> to vector<1xf32>
      %35 = vector.shape_cast %34 : vector<1xf32> to vector<1x1x1xf32>
      %36 = vector.extract %35[0, 0, 0] : f32 from vector<1x1x1xf32>
      %37 = vector.broadcast %36 : f32 to vector<1x1x8x128xf32>
      %38 = arith.addf %31, %37 : vector<1x1x8x128xf32>
      %c0_30 = arith.constant 0 : index
      %c0_31 = arith.constant 0 : index
      %c0_32 = arith.constant 0 : index
      %c0_33 = arith.constant 0 : index
      %39 = vector.load %arg7[%c0_30, %c0_31, %c0_32, %c0_33] : memref<1x1x8x128xf32, #tpu.memory_space<vmem>>, vector<1x1x8x128xf32>
      tpu.vector_store %arg7[%c0_30, %c0_31, %c0_32, %c0_33], %38 {strides = array<i32>} : memref<1x1x8x128xf32, #tpu.memory_space<vmem>>, vector<1x1x8x128xf32>,
    } else {
    }
    return
  }
  func.func @transform_0(%arg0: i32, %arg1: i32, %arg2: i32) -> (i32, i32, i32) {
    %c1_i32 = arith.constant 1 : i32
    %0 = arith.muli %arg1, %c1_i32 : i32
    %1 = arith.addi %0, %arg2 : i32
    %c0_i32 = arith.constant 0 : i32
    %c0_i32_0 = arith.constant 0 : i32
    return %arg0, %c0_i32, %1 : i32, i32, i32
  }
  func.func @transform_1(%arg0: i32, %arg1: i32, %arg2: i32) -> (i32, i32, i32) {
    %c1_i32 = arith.constant 1 : i32
    %0 = arith.muli %arg1, %c1_i32 : i32
    %1 = arith.addi %0, %arg2 : i32
    %c0_i32 = arith.constant 0 : i32
    %c0_i32_0 = arith.constant 0 : i32
    return %arg0, %c0_i32, %1 : i32, i32, i32
  }
  func.func @transform_2(%arg0: i32, %arg1: i32, %arg2: i32) -> (i32, i32, i32) {
    %c1_i32 = arith.constant 1 : i32
    %0 = arith.muli %arg1, %c1_i32 : i32
    %1 = arith.addi %0, %arg2 : i32
    %c0_i32 = arith.constant 0 : i32
    %c0_i32_0 = arith.constant 0 : i32
    return %arg0, %c0_i32, %1 : i32, i32, i32
  }
  func.func @transform_3(%arg0: i32, %arg1: i32, %arg2: i32) -> (i32, i32, i32, i32) {
    %c0_i32 = arith.constant 0 : i32
    %c0_i32_0 = arith.constant 0 : i32
    %c0_i32_1 = arith.constant 0 : i32
    return %arg0, %arg1, %c0_i32, %c0_i32_0 : i32, i32, i32, i32
  }
  func.func @transform_4(%arg0: i32, %arg1: i32, %arg2: i32) -> (i32, i32, i32, i32) {
    %c0_i32 = arith.constant 0 : i32
    %c0_i32_0 = arith.constant 0 : i32
    %c0_i32_1 = arith.constant 0 : i32
    return %arg0, %arg1, %c0_i32, %c0_i32_0 : i32, i32, i32, i32
  }
}

</mosaic_0001>

<bundles_post_ra>
// kernel: tpu_custom_call.1
= control target key start
LH: loop header
LB: loop body
LE: loop exit
PB: predicated region body
PF: predicated region fallthrough
CT: control target
= control target key end

     0   :  { %10 = vsyncpa [#allocation5], 0  ;;  %s1217_s0 = inlined_call_operand.hbm [shape: f32[2,4,256], index: 0, kind: input, shape index: {}]   ;;  %s1218_s1 = inlined_call_operand.hbm [shape: f32[2,4,256], index: 1, kind: input, shape index: {}]   ;;  %s1219_s2 = inlined_call_operand.vmem [shape: f32[2,1,256], index: 2, kind: input, shape index: {}]   ;;  %s1220_s3 = inlined_call_operand.hbm [shape: f32[2,1,8,128], index: 3, kind: output, shape index: {0}]   ;;  %s1221_s4 = inlined_call_operand.hbm [shape: f32[2,1,8,128], index: 4, kind: output, shape index: {1}]  }
   0x1   :  { %12 = vsyncpa [#allocation5 + $0x1], 0 }
   0x2   :  { %13 = vsyncpa [#allocation8], 0 }
   0x3   :  { %15 = vsyncpa [#allocation8 + $0x1], 0 }
   0x4   :  { %16 = vsyncpa [#allocation6], 0 }
   0x5   :  { %18 = vsyncpa [#allocation6 + $0x1], 0 }
   0x6   :  { %19 = vsyncpa [#allocation11], 0 }
   0x7   :  { %21 = vsyncpa [#allocation11 + $0x1], 0  ;;  %s938_s15 = smov 0   ;;  %s940_s16 = smov 0  }
   0x8   :  { %s942_s17 = smov 0   ;;  %s944_s18 = smov 0  }
   0x9   :  { %s946_s19 = smov 0   ;;  %s948_s20 = smov 0  }
   0xa LB: > { %s627_s21 = sadd.s32 4294967295, %s906_s20   ;;  %s628_s22 = sadd.s32 4294967294, %s906_s20   ;;  %s906_s20 = sphi %s948_s20, %s27_s20   ;;  %s902_s19 = sphi %s946_s19, %s1243_s19   ;;  %s898_s18 = sphi %s944_s18, %s1242_s18   ;;  %s894_s17 = sphi %s942_s17, %s1241_s17   ;;  %s890_s16 = sphi %s940_s16, %s1240_s16   ;;  %s886_s15 = sphi %s938_s15, %s1239_s15  }
   0xb   : > { %s46_s23 = sadd.s32 1, %s902_s19  ;;  %s57_s24 = sadd.s32 1, %s894_s17 }
   0xc   : > { %p48_p0 = scmp.ge.s32.totalorder %s46_s23, 2  ;;  %p64_p1 = scmp.ne.s32.totalorder %s894_s17, %s890_s16 }
   0xd   : > { %p65_p2 = scmp.eq.s32.totalorder %s906_s20, 0  ;;  %p70_p3 = scmp.ne.s32.totalorder %s890_s16, %s886_s15 }
   0xe   : > { %s1245_s23 = smov (%p48_p0, %s46_s23), 0  ;;  %p71_p5 = scmp.eq.s32.totalorder %s627_s21, 0 }
   0xf   : > { %p979_p4 = por %p65_p2, %p64_p1  ;;  %s52_s26 = ssub.s32 %s902_s19, %s1245_s23 }
  0x10   : > { %p156_p6 = scmp.eq.s32.totalorder %s627_s21, 1  ;;  %p55_p7 = scmp.eq.s32.totalorder %s52_s26, 0 }
  0x11   : > { %p985_p8 = por %p71_p5, %p70_p3  ;;  %p162_p10 = scmp.eq.s32.totalorder %s628_s22, 1 }
  0x12   : > { %p989_p9 = por %p156_p6, %p64_p1  ;;  %p677_p13 = scmp.lt.s32.totalorder %s906_s20, 2 }
  0x13   : > { %s1225_s27 = scalar_select %p985_p8, 1, 0 }
  0x14   : > { %s1226_s28 = scalar_select %p989_p9, 1, 0 }
  0x15   : > { %s994_s29 = scalar_select %p55_p7, %s894_s17, %s57_s24  }
  0x16   : > { %p996_p11 = por %p162_p10, %p70_p3  ;;  %s1003_s5 = sand.u32 1, %s894_s17  }
  0x17   : > { %s631_s6 = sshll.u32 %s1003_s5, 3  ;;  %s649_s7 = sshll.u32 %s902_s19, 7 }
  0x18   : > { %s1227_s30 = scalar_select %p996_p11, 1, 0 }
  0x19   : > { %s1012_s10 = scalar_lea.hbm %s1217_s0, %s649_s7  ;;  %s214_s11 = scalar_lea.vmem [#allocation4], %s631_s6 }
  0x1a   : > { %s225_s12 = sshll.u32 %s214_s11, 4  ;;  %p1020_p0 = pnand %p677_p13, %p979_p4  ;;  %s1016_s12 = int_to_ptr.vmem [resolvable:$true] %s225_s12 }
  0x1b   : > { %s211_s14 = scalar_lea.sflag [#allocation5], %s1003_s5  ;;  %s728_s21 = scalar_lea.hbm %s1012_s10, 128 }
  0x1c   : > { %p729_p3 = scmp.ne.s32.totalorder %s1012_s10, %s728_s21  ;;  %p730_p5 = pneg %p1020_p0 }
  0x1d   : > { %s733_s25 = scalar_lea.hbm %s1217_s0, 256  ;;  %p734_p4 = scmp.lt.u32.totalorder %s1012_s10, %s1217_s0 }
  0x1e   : > { %p731_p6 = pnand %p730_p5, %p729_p3  ;;  %p735_p10 = scmp.lt.u32.totalorder %s733_s25, %s728_s21 }
  0x1f   : > { %p737_p12 = scmp.lt.u32.totalorder %s728_s21, %s1012_s10 }
  0x20   : > { %p732_p7 = pneg %p731_p6  ;;  %p736_p13 = por %p735_p10, %p734_p4 }
  0x22   : > { %p738_p1 = por %p737_p12, %p736_p13 }
  0x24   : > { %p739_p2 = pnand %p738_p1, %p732_p7 }
  0x26   : > { %742 = shalt.err (!%p739_p2)
}
  0x27   : > { %s743_s9 = scalar_lea.vmem %s1016_s12, 128  ;;  %s908_s11 = smov [#allocation4]  }
  0x28   : > { %p744_p3 = scmp.ne.s32.totalorder %s1016_s12, %s743_s9  ;;  %s748_s22 = sshll.u32 %s908_s11, 4  ;;  %s749_s22 = int_to_ptr.vmem [resolvable:$false] %s748_s22 }
  0x29   : > { %s750_s24 = scalar_lea.vmem %s749_s22, 256  ;;  %p751_p9 = scmp.lt.s32.totalorder %s1016_s12, %s749_s22 }
  0x2a   : > { %p746_p6 = pnand %p744_p3, %p730_p5  ;;  %p752_p4 = scmp.lt.s32.totalorder %s750_s24, %s743_s9 }
  0x2c   : > { %p747_p11 = pneg %p746_p6  ;;  %p753_p10 = por %p752_p4, %p751_p9 }
  0x2e   : > { %p754_p12 = pnand %p753_p10, %p747_p11 }
  0x30   : > { %757 = shalt.err (!%p754_p12)
}
  0x31   : > { %666 = dma.hbm_to_vmem [thread:$0]  (!%p1020_p0), %s1012_s10, 128, %s1016_s12, %s211_s14  }
  0x32   : > { %p1229_p1 = scmp.lt.s32.totalorder %s906_s20, 3  ;;  %p1230_p2 = scmp.ge.s32.totalorder %s906_s20, 1 }
  0x33   : > { %s1065_s8 = scalar_lea.hbm %s1218_s1, %s649_s7  ;;  %s236_s9 = scalar_lea.vmem [#allocation7], %s631_s6 }
  0x34   : > { %p1056_p7 = pnand %p1230_p2, %p1229_p1  ;;  %s247_s11 = sshll.u32 %s236_s9, 4  ;;  %s248_s11 = int_to_ptr.vmem [resolvable:$true] %s247_s11 }
  0x35   : > { %s233_s10 = scalar_lea.sflag [#allocation8], %s1003_s5  ;;  %s758_s12 = scalar_lea.hbm %s1065_s8, 128 }
  0x36   : > { %s1231_s21 = scalar_select %p1056_p7, 1, 0 }
  0x37   : > { %p759_p9 = scmp.ne.s32.totalorder %s1065_s8, %s758_s12  ;;  %s763_s7 = scalar_lea.hbm %s1218_s1, 256 }
  0x38   : > { %p764_p3 = scmp.lt.u32.totalorder %s1065_s8, %s1218_s1  ;;  %p765_p6 = scmp.lt.u32.totalorder %s763_s7, %s758_s12 }
  0x39   : > { %p761_p11 = pnand %p759_p9, %p730_p5  ;;  %p767_p10 = scmp.lt.u32.totalorder %s758_s12, %s1065_s8 }
  0x3a   : > { %p766_p4 = por %p765_p6, %p764_p3 }
  0x3b   : > { %p762_p13 = pneg %p761_p11 }
  0x3c   : > { %p768_p12 = por %p767_p10, %p766_p4 }
  0x3e   : > { %p769_p1 = pnand %p768_p12, %p762_p13 }
  0x40   : > { %772 = shalt.err (!%p769_p1)
}
  0x41   : > { %s773_s5 = scalar_lea.vmem %s248_s11, 128  ;;  %s909_s6 = smov [#allocation7]  }
  0x42   : > { %p774_p2 = scmp.ne.s32.totalorder %s248_s11, %s773_s5  ;;  %s778_s26 = sshll.u32 %s909_s6, 4  ;;  %s779_s26 = int_to_ptr.vmem [resolvable:$false] %s778_s26 }
  0x43   : > { %s780_s9 = scalar_lea.vmem %s779_s26, 256  ;;  %p781_p8 = scmp.lt.s32.totalorder %s248_s11, %s779_s26 }
  0x44   : > { %p776_p9 = pnand %p774_p2, %p730_p5  ;;  %p782_p7 = scmp.lt.s32.totalorder %s780_s9, %s773_s5 }
  0x46   : > { %p777_p11 = pneg %p776_p9  ;;  %p783_p3 = por %p782_p7, %p781_p8 }
  0x48   : > { %p784_p6 = pnand %p783_p3, %p777_p11 }
  0x4a   : > { %787 = shalt.err (!%p784_p6)
}
  0x4b   : > { %669 = dma.hbm_to_vmem [thread:$0]  (!%p1020_p0), %s1065_s8, 128, %s248_s11, %s233_s10  }
  0x4c   : > { %p1232_p13 = scmp.ne.s32.totalorder %s1231_s21, 0 }
  0x4d   : > { %s1092_s12 = sand.u32 (!%p1232_p13), 1, %s890_s16   ;;  %p1233_p8 = scmp.ne.s32.totalorder (!%p1232_p13), %s1225_s27, 0 }
  0x4e   : > { %270 = sbr.rel (%p1232_p13) target bundleno = 351 (0x15f), region = 32  ;;  %s1095_s14 = sshll.u32 (!%p1232_p13), %s1092_s12, 3 }
  0x4f   : > { %s273_s22 = scalar_lea.sflag (!%p1232_p13), [#allocation5], %s1092_s12  ;;  %s276_s7 = scalar_lea.vmem (!%p1232_p13), [#allocation4], %s1095_s14 }
  0x55   : > { %869 = dma.done.wait (%p1233_p8), %s273_s22, 128  }
  0x56   : > { %871 = vsyncadd (%p1233_p8), %s273_s22, 4294967168  ;;  %s282_s13 = scalar_lea.sflag [#allocation8], %s1092_s12  ;;  %s285_s21 = scalar_lea.vmem [#allocation7], %s1095_s14 }
  0x57   : > { %873 = dma.done.wait (%p1233_p8), %s282_s13, 128  }
  0x58   : > { %875 = vsyncadd (%p1233_p8), %s282_s13, 4294967168  ;;  %p335_p0 = scmp.lt.s32.totalorder %s898_s18, 1  ;;  %v349_v0 = vlaneseq  ;;  %v910_v3 = vmov 0.0   ;;  %v354_v6 = vld [vmem:[%s276_s7] sm:$0xff]  ;;  %v355_v7 = vld [vmem:[%s285_s21] sm:$0xff]  ;;  %vm388_vm1 = vcmask 1043456  }
  0x59   : > { %v357_v9 = vsub.f32 %v355_v7, %v354_v6  ;;  %vm416_vm2 = vcmask 1040384   ;;  %s645_s25 = sshll.u32 %s898_s18, 7  ;;  %s321_s5 = scalar_lea.vmem [#allocation9], %s1095_s14 }
  0x5a   : > { %s336_s8 = scalar_select %p335_p0, %s898_s18, 1  ;;  %vm1111_vm0 = vcmp.lt.s32.totalorder %v349_v0, 256  ;;  %v360_v2 = vshrl.u32 %v349_v0, 7 }
  0x5b   : > { %353 = vst.msk [vmem:[#allocation3] sm:$0x3] %vm1111_vm0, %v910_v3  ;;  %s452_s6 = sshll.u32 %s321_s5, 4  ;;  %s1129_s22 = scalar_lea.hbm %s1220_s3, %s645_s25  ;;  %s1131_s6 = int_to_ptr.vmem [resolvable:$true] %s452_s6 }
  0x5c   : > { %s642_s11 = sshll.u32 %s336_s8, 1  ;;  %v361_v4 = vsub.s32 0, %v360_v2  ;;  %v365_v5 = vsub.s32 1, %v360_v2  ;;  %s328_s13 = scalar_lea.vmem [#allocation10], %s1095_s14 }
  0x5d   : > { %s341_s24 = scalar_lea.vmem %s1219_s2, %s642_s11  ;;  %s1136_s21 = sshll.u32 %s328_s13, 4  ;;  %s1161_s21 = int_to_ptr.vmem [resolvable:$true] %s1136_s21 }
  0x5e   : > { %v356_v8 = vld [vmem:[%s341_s24] sm:$0x3]  ;;  %s433_s8 = scalar_lea.sflag [#allocation6], %s1092_s12  ;;  %s788_s11 = scalar_lea.vmem %s1131_s6, 128 }
  0x5f   : > { %v362_v10 = vrot.slane %v356_v8, %v361_v4  ;;  %v366_v11 = vrot.slane %v356_v8, %v365_v5  ;;  %p789_p5 = scmp.ne.s32.totalorder %s1131_s6, %s788_s11  ;;  %p1236_p7 = scmp.ne.s32.totalorder %s1226_s28, 0 }
  0x60   : > { %s911_s10 = smov [#allocation9]  }
  0x61   : > { %v367_v12 = vcombine.low %v362_v10, %v366_v11  ;;  %p790_p4 = pnand %p789_p5, %p1236_p7  ;;  %s792_s27 = sshll.u32 %s911_s10, 4  ;;  %s793_s27 = int_to_ptr.vmem [resolvable:$false] %s792_s27 }
  0x62   : > { %v374_v13 = vld [vmem:[#allocation3] sm:$0x3]  ;;  %s794_s24 = scalar_lea.vmem %s793_s27, 256  ;;  %p795_p12 = scmp.lt.s32.totalorder %s1131_s6, %s793_s27 }
  0x63   : > { %v375_v14 = vadd.f32 %v374_v13, %v356_v8  ;;  %v369_v15 = vmul.f32 %v367_v12, %v357_v9  ;;  %p791_p10 = pneg %p790_p4  ;;  %p796_p1 = scmp.lt.s32.totalorder %s794_s24, %s788_s11 }
  0x65   : > { %380 = vst.msk [vmem:[#allocation3] sm:$0x3] %vm1111_vm0, %v375_v14  ;;  %v371_v16 = vmul.f32 %v369_v15, %v369_v15  ;;  %p797_p2 = por %p796_p1, %p795_p12 }
  0x67   : > { %v386_v17 = vcombine.high %v371_v16, %v371_v16  ;;  %v389_v18 = vsel %vm388_vm1, %v371_v16, 0.0  ;;  %p798_p9 = pnand %p797_p2, %p791_p10 }
  0x69   : > { %v390_v19 = vsel %vm388_vm1, %v386_v17, 0.0 }
  0x6a   : > { %v391_v20 = vadd.f32 %v390_v19, %v389_v18 }
  0x6c   : > { %v404_v21 = vld [vmem:[#allocation3] sm:$0x3]  ;;  %392 = vadd.xlane.f32.xlu0 %v391_v20 }
  0x6d   : > { %v409_v22 = vrot.slane %v404_v21, %v361_v4  ;;  %v413_v23 = vrot.slane %v404_v21, %v365_v5 }
  0x6f   : > { %v417_v24 = vsel %vm416_vm2, %v409_v22, 0.0  ;;  %v418_v25 = vsel %vm416_vm2, %v413_v23, 0.0 }
  0x70   : > { %v419_v26 = vadd.f32 %v418_v25, %v417_v24 }
  0x72   : > { %420 = vadd.xlane.f32.xlu0 %v419_v26 }
  0xf9   : > { %v393_v27 = vpop.xlane.xlu0 %392 }
  0xfa   : > { %v394_v28 = vrot.slane %v393_v27, 4 }
  0xfc   : > { %v395_v29 = vadd.f32 %v394_v28, %v393_v27 }
  0xfe   : > { %v396_v30 = vrot.slane %v395_v29, 2 }
  0xff   : > { %v421_v31 = vpop.xlane.xlu0 %420 }
 0x100   : > { %v422_v32 = vrot.slane %v421_v31, 4  ;;  %v397_v33 = vadd.f32 %v396_v30, %v395_v29 }
 0x102   : > { %v423_v34 = vadd.f32 %v422_v32, %v421_v31  ;;  %v398_v35 = vrot.slane %v397_v33, 1 }
 0x104   : > { %v424_v36 = vrot.slane %v423_v34, 2  ;;  %v399_v37 = vadd.f32 %v398_v35, %v397_v33 }
 0x106   : > { %v425_v38 = vadd.f32 %v424_v36, %v423_v34  ;;  %651 = vpush %v399_v37 }
 0x108   : > { %v426_v39 = vrot.slane %v425_v38, 1 }
 0x10a   : > { %v427_v40 = vadd.f32 %v426_v39, %v425_v38 }
 0x10c   : > { %653 = vpush %v427_v40 }
 0x137   : > { %s652_s7 = spop %651 }
 0x138   : > { %v401_v41 = vstv %s652_s7 }
 0x139   : > { %403 = vst [vmem:[%s321_s5] sm:$0xff] %v401_v41 }
 0x13a   : > { %801 = shalt.err (!%p798_p9)
}
 0x13b   : > { %s802_s5 = scalar_lea.hbm %s1129_s22, 128  ;;  %s806_s7 = scalar_lea.hbm %s1220_s3, 256 }
 0x13c   : > { %p803_p11 = scmp.ne.s32.totalorder %s1129_s22, %s802_s5  ;;  %p807_p13 = scmp.lt.u32.totalorder %s1129_s22, %s1220_s3 }
 0x13d   : > { %p808_p8 = scmp.lt.u32.totalorder %s806_s7, %s802_s5  ;;  %p810_p5 = scmp.lt.u32.totalorder %s802_s5, %s1129_s22 }
 0x13e   : > { %p804_p3 = pnand %p803_p11, %p1236_p7 }
 0x13f   : > { %p809_p0 = por %p808_p8, %p807_p13 }
 0x140   : > { %p805_p6 = pneg %p804_p3 }
 0x141   : > { %p811_p4 = por %p810_p5, %p809_p0 }
 0x143   : > { %p812_p10 = pnand %p811_p4, %p805_p6 }
 0x145   : > { %815 = shalt.err (!%p812_p10)
}
 0x146   : > { %659 = dma.vmem_to_hbm [thread:$0]  (%p1236_p7), %s1131_s6, 128, %s1129_s22, %s433_s8  }
 0x147   : > { %s654_s11 = spop %653  ;;  %s1168_s26 = scalar_lea.hbm %s1221_s4, %s645_s25 }
 0x148   : > { %v429_v42 = vstv %s654_s11  ;;  %s438_s9 = scalar_lea.sflag [#allocation11], %s1092_s12  ;;  %s816_s7 = scalar_lea.vmem %s1161_s21, 128 }
 0x149   : > { %431 = vst [vmem:[%s328_s13] sm:$0xff] %v429_v42  ;;  %p817_p12 = scmp.ne.s32.totalorder %s1161_s21, %s816_s7  ;;  %s912_s6 = smov [#allocation10]  }
 0x14a   : > { %s820_s22 = sshll.u32 %s912_s6, 4  ;;  %s821_s22 = int_to_ptr.vmem [resolvable:$false] %s820_s22 }
 0x14b   : > { %p818_p1 = pnand %p817_p12, %p1236_p7  ;;  %s822_s8 = scalar_lea.vmem %s821_s22, 256 }
 0x14c   : > { %p823_p9 = scmp.lt.s32.totalorder %s1161_s21, %s821_s22  ;;  %p824_p11 = scmp.lt.s32.totalorder %s822_s8, %s816_s7 }
 0x14d   : > { %p819_p2 = pneg %p818_p1 }
 0x14e   : > { %p825_p3 = por %p824_p11, %p823_p9 }
 0x150   : > { %p826_p6 = pnand %p825_p3, %p819_p2 }
 0x152   : > { %829 = shalt.err (!%p826_p6)
}
 0x153   : > { %s830_s18 = scalar_lea.hbm %s1168_s26, 128  ;;  %s834_s25 = scalar_lea.hbm %s1221_s4, 256 }
 0x154   : > { %p831_p13 = scmp.ne.s32.totalorder %s1168_s26, %s830_s18  ;;  %p835_p5 = scmp.lt.u32.totalorder %s1168_s26, %s1221_s4 }
 0x155   : > { %p836_p4 = scmp.lt.u32.totalorder %s834_s25, %s830_s18  ;;  %p838_p12 = scmp.lt.u32.totalorder %s830_s18, %s1168_s26 }
 0x156   : > { %p832_p8 = pnand %p831_p13, %p1236_p7 }
 0x157   : > { %p837_p10 = por %p836_p4, %p835_p5 }
 0x158   : > { %p833_p0 = pneg %p832_p8 }
 0x159   : > { %p839_p1 = por %p838_p12, %p837_p10 }
 0x15b   : > { %p840_p2 = pnand %p839_p1, %p833_p0 }
 0x15d   : > { %843 = shalt.err (!%p840_p2)
}
 0x15e   : > { %660 = dma.vmem_to_hbm [thread:$0]  (%p1236_p7), %s1161_s21, 128, %s1168_s26, %s438_s9  }
 0x15f PF: > { %s478_s27 = sand.u32 1, %s886_s15   ;;  %p1237_p9 = scmp.ne.s32.totalorder %s1227_s30, 0 }
 0x160   : > { %p1238_p11 = scmp.ge.s32.totalorder %s906_s20, 2  ;;  %s479_s11 = scalar_lea.sflag [#allocation6], %s478_s27 }
 0x162   : > { %p671_p3 = pnand %p1238_p11, %p1237_p9 }
 0x164   : > { %877 = dma.done.wait (!%p671_p3), %s479_s11, 128  }
 0x165   : > { %879 = vsyncadd (!%p671_p3), %s479_s11, 4294967168  ;;  %s488_s24 = scalar_lea.sflag [#allocation11], %s478_s27 }
 0x166   : > { %881 = dma.done.wait (!%p671_p3), %s488_s24, 128  }
 0x167   : > { %883 = vsyncadd (!%p671_p3), %s488_s24, 4294967168  ;;  %s27_s20 = sadd.s32 1, %s906_s20   ;;  %s1239_s15 = smov %s890_s16 }
 0x168   : > { %p24_p6 = scmp.ge.s32.totalorder %s27_s20, 4   ;;  %s1240_s16 = smov %s894_s17 }
 0x169   : > { %s1241_s17 = smov %s994_s29  ;;  %s1242_s18 = smov %s902_s19 }
 0x16a   : > { %s1243_s19 = smov %s1245_s23  ;;  %26 = sbr.rel (!%p24_p6) target bundleno = 10 (0xa), region = 118 }
 0x171   :  { %493 = vsyncpa [#allocation5], 1 }
 0x172   :  { %495 = vsyncpa [#allocation5 + $0x1], 1 }
 0x173   :  { %496 = vsyncpa [#allocation8], 1 }
 0x174   :  { %498 = vsyncpa [#allocation8 + $0x1], 1 }
 0x175   :  { %499 = vsyncpa [#allocation6], 1 }
 0x176   :  { %501 = vsyncpa [#allocation6 + $0x1], 1 }
 0x177   :  { %502 = vsyncpa [#allocation11], 1 }
 0x178   :  { %504 = vsyncpa [#allocation11 + $0x1], 1 }

</bundles_post_ra>
